<compile_context>
chip_gen: v6e
topology: v6e:2x2x1
jax: 0.10.0
libtpu: 0.0.40
codegen_flags: <defaults>
</compile_context>

<pallas_src>
import functools

import jax
import jax.numpy as jnp
from jax import lax
from jax.experimental import pallas as pl
from jax.experimental.pallas import tpu as pltpu


def _bisection_kernel(*refs, callback, abs_tol, max_iters, unroll, n_args):
    arg_refs = refs[:n_args]
    x_out_ref, negdfy_out_ref, err_out_ref = refs[n_args:]

    args = tuple(r[...] for r in arg_refs)
    shape = x_out_ref.shape

    left = jnp.zeros(shape, jnp.float32)    # forward(): left = zeros_like(x0)
    right = jnp.ones(shape, jnp.float32)    # forward(): right = ones_like(x0)

    def one_iter(carry):
        left, right, x, fy = carry
        # Bracket update from the previous iteration's residual (torch order).
        right = jnp.where(fy >= abs_tol, x, right)
        left = jnp.where(fy <= -abs_tol, x, left)
        x = (left + right) * 0.5
        # dfy is dead inside the loop (only the final value is used); it is not
        # in the carry, so the compiler DCEs its arithmetic.
        fy = callback(x, *args)[0]
        return (left, right, x, fy)

    # Torch iteration 0.
    x = (left + right) * 0.5
    fy = callback(x, *args)[0]
    carry = (left, right, x, fy)

    # Remaining max_iters-1 iterations: `rem` prologue iterations, then up to
    # `n_chunks` chunks of `unroll` iterations with an early-exit convergence
    # check per chunk.  Once converged, iterations are exact fixed points, so
    # checking only every `unroll` steps reproduces torch's early return.
    n_rem = max_iters - 1
    rem = n_rem % unroll
    n_chunks = n_rem // unroll

    for _ in range(rem):
        carry = one_iter(carry)

    if n_chunks > 0:
        def cond(state):
            i, _, _, _, fy = state
            return jnp.logical_and(i < n_chunks,
                                   jnp.max(jnp.abs(fy)) >= abs_tol)

        def body(state):
            i, left, right, x, fy = state
            c = (left, right, x, fy)
            for _ in range(unroll):     # partial unroll for the LLO scheduler
                c = one_iter(c)
            return (i + 1,) + c

        state = (jnp.int32(0),) + carry
        state = lax.while_loop(cond, body, state)
        carry = state[1:]

    _, _, x, _ = carry

    # Single full callback eval at the final (converged / frozen) x: gives the
    # dfy the torch module would return and the residual for the raise check.
    fy, dfy = callback(x, *args)

    x_out_ref[...] = x.astype(x_out_ref.dtype)
    negdfy_out_ref[...] = (-dfy).astype(negdfy_out_ref.dtype)
    # Tiny per-tile max|fy| output (instead of a full residual writeback).
    err_out_ref[...] = jnp.broadcast_to(
        jnp.max(jnp.abs(fy)).astype(jnp.float32), err_out_ref.shape)


def _round_up(x, m):
    return ((x + m - 1) // m) * m


def _plan_tiling(n_elems):
    """Pick (lane width C, rows per tile TR, total padded rows)."""
    C = 512 if n_elems >= 4096 else 128          # lane-dense, multiple of 128
    MAX_TR = 256                                 # 256x512 f32 tile = 512 KiB
    rows = _round_up(max(1, (n_elems + C - 1) // C), 8)
    if rows > MAX_TR:
        TR = MAX_TR
        rows = _round_up(rows, TR)
    elif rows >= 16:
        # Split into >=2 grid programs so both v7x TensorCores get work.
        TR = _round_up(rows // 2, 8)
        rows = _round_up(rows, TR)
    else:
        TR = rows
    return C, TR, rows


def bisection_root_finder(callback, x0, *callback_args, abs_tol=1e-5,
                          max_iters=100, raise_exception=True, unroll=4):
    """Returns (x, -dfy) exactly like bgflow's bisection_inverse."""
    orig_shape = x0.shape
    out_dtype = x0.dtype
    n = x0.size
    n_args = len(callback_args)

    C, TR, rows = _plan_tiling(n)
    n_pad = rows * C
    num_tiles = rows // TR

    def _prep(a):
        a = jnp.asarray(a)
        if jnp.issubdtype(a.dtype, jnp.floating):
            a = a.astype(jnp.float32)            # abs_tol=1e-5 needs f32
        flat = jnp.ravel(a)
        # Edge padding: padded lanes duplicate a real problem instance, so they
        # converge with it and never poison the convergence check.
        flat = jnp.pad(flat, (0, n_pad - n), mode="edge")
        return flat.reshape(rows, C)

    args2d = tuple(_prep(a) for a in callback_args)

    kernel = functools.partial(
        _bisection_kernel, callback=callback, abs_tol=float(abs_tol),
        max_iters=int(max_iters), unroll=int(unroll), n_args=n_args)

    tile_spec = pl.BlockSpec((TR, C), lambda i: (i, 0))
    err_spec = pl.BlockSpec((1, 8, 128), lambda i: (i, 0, 0))

    # VMEM budget: double-buffered inputs/outputs + in-kernel loop carry.
    tile_bytes = TR * C * 4
    vmem_est = tile_bytes * (2 * n_args + 2 * 2 + 6)
    vmem_limit = int(min(48 * 2 ** 20, max(32 * 2 ** 20, 2 * vmem_est)))

    x2d, negdfy2d, err = pl.pallas_call(
        kernel,
        out_shape=(
            jax.ShapeDtypeStruct((rows, C), jnp.float32),            # root x
            jax.ShapeDtypeStruct((rows, C), jnp.float32),            # -dfy
            jax.ShapeDtypeStruct((num_tiles, 8, 128), jnp.float32),  # max|fy|
        ),
        grid=(num_tiles,),
        in_specs=[tile_spec] * n_args,
        out_specs=(tile_spec, tile_spec, err_spec),
        compiler_params=pltpu.CompilerParams(
            dimension_semantics=("parallel",),
            vmem_limit_bytes=vmem_limit),
    )(*args2d)

    x = x2d.reshape(-1)[:n].reshape(orig_shape).astype(out_dtype)
    neg_dfy = negdfy2d.reshape(-1)[:n].reshape(orig_shape).astype(out_dtype)

    if raise_exception:
        max_err = jnp.max(err)
        try:
            max_err_f = float(max_err)
        except jax.errors.ConcretizationTypeError:
            # TODO(synk): under an outer jax.jit the ValueError path cannot run
            # (would need checkify); caller must check convergence itself.
            max_err_f = None
        if max_err_f is not None and not (max_err_f < float(abs_tol)):
            raise ValueError(
                f"Root finding did not converge: error={max_err_f:.5}")
    return x, neg_dfy


class BisectionRootFinder:
    """JAX/Pallas port of bgflow's BisectionRootFinder module."""

    def __init__(self, abs_tol=1e-5, max_iters=100, verbose=False,
                 raise_exception=True):
        self._abs_tol = float(abs_tol)       # buffer '_abs_tol'
        self._max_iters = max_iters
        self._verbose = verbose  # TODO(synk): per-iteration verbose printing has no clean in-kernel equivalent (would need pl.debug_print in the while body).
        self._raise_exception = raise_exception

    def __call__(self, callback, x0, *callback_args):
        return bisection_root_finder(
            callback, x0, *callback_args,
            abs_tol=self._abs_tol,
            max_iters=self._max_iters,
            raise_exception=self._raise_exception,
        )


if __name__ == "__main__":
    key = jax.random.PRNGKey(0)
    B, D = 8, 128  # (batch, features) — small, lane-aligned demo shape

    # x0 only provides shape/dtype in the torch module (bracket reset to [0,1]).
    k0, k1 = jax.random.split(key)
    x0 = jax.random.uniform(k0, (B, D), jnp.float32)

    # Deterministic synthetic monotone callback: f(x) = x^3 + x - y with
    # y in (0, 2) so the root lies in [0, 1].  Returns (fy, dfy) like the
    # bgflow callbacks do.
    y_target = 2.0 * jax.random.uniform(k1, (B, D), jnp.float32)

    def callback(x, y):
        fy = x * x * x + x - y
        dfy = 3.0 * x * x + 1.0
        return fy, dfy

    root_finder = BisectionRootFinder(abs_tol=1e-5, max_iters=100)
    x_root, neg_dfy = root_finder(callback, x0, y_target)
    jax.block_until_ready((x_root, neg_dfy))
    print("KERNEL_OK")
</pallas_src>

<mosaic_0001>
module attributes {stable_mosaic.version = 11 : i64} {
  func.func @_bisection_kernel(%arg0: i32, %arg1: memref<8x128xf32, #tpu.memory_space<vmem>>, %arg2: memref<8x128xf32, #tpu.memory_space<vmem>>, %arg3: memref<8x128xf32, #tpu.memory_space<vmem>>, %arg4: memref<1x8x128xf32, #tpu.memory_space<vmem>>) attributes {dimension_semantics = [#tpu.dimension_semantics<parallel>], iteration_bounds = array<i64: 1>, scalar_prefetch = 0 : i64, scratch_operands = 0 : i64, tpu.core_type = #tpu.core_type<tc>, window_params = [{transform_indices = @transform_0, window_bounds = array<i64: 8, 128>}, {transform_indices = @transform_1, window_bounds = array<i64: 8, 128>}, {transform_indices = @transform_2, window_bounds = array<i64: 8, 128>}, {transform_indices = @transform_3, window_bounds = array<i64: 1, 8, 128>}]} {
    %c0 = arith.constant 0 : index
    %c0_0 = arith.constant 0 : index
    %0 = vector.load %arg1[%c0, %c0_0] : memref<8x128xf32, #tpu.memory_space<vmem>>, vector<8x128xf32>
    %cst = arith.constant 0.000000e+00 : f32
    %1 = vector.broadcast %cst : f32 to vector<8x128xf32>
    %cst_1 = arith.constant 1.000000e+00 : f32
    %2 = vector.broadcast %cst_1 : f32 to vector<8x128xf32>
    %3 = arith.addf %1, %2 : vector<8x128xf32>
    %cst_2 = arith.constant 5.000000e-01 : f32
    %4 = vector.broadcast %cst_2 : f32 to vector<8x128xf32>
    %5 = arith.mulf %3, %4 : vector<8x128xf32>
    %6 = arith.mulf %5, %5 : vector<8x128xf32>
    %7 = arith.mulf %6, %5 : vector<8x128xf32>
    %8 = arith.addf %7, %5 : vector<8x128xf32>
    %9 = arith.subf %8, %0 : vector<8x128xf32>
    %cst_3 = arith.constant 9.99999974E-6 : f32
    %10 = vector.broadcast %cst_3 : f32 to vector<8x128xf32>
    %11 = arith.cmpf oge, %9, %10 : vector<8x128xf32>
    %12 = arith.select %11, %5, %2 : vector<8x128xi1>, vector<8x128xf32>
    %cst_4 = arith.constant -9.99999974E-6 : f32
    %13 = vector.broadcast %cst_4 : f32 to vector<8x128xf32>
    %14 = arith.cmpf ole, %9, %13 : vector<8x128xf32>
    %15 = arith.select %14, %5, %1 : vector<8x128xi1>, vector<8x128xf32>
    %16 = arith.addf %15, %12 : vector<8x128xf32>
    %cst_5 = arith.constant 5.000000e-01 : f32
    %17 = vector.broadcast %cst_5 : f32 to vector<8x128xf32>
    %18 = arith.mulf %16, %17 : vector<8x128xf32>
    %19 = arith.mulf %18, %18 : vector<8x128xf32>
    %20 = arith.mulf %19, %18 : vector<8x128xf32>
    %21 = arith.addf %20, %18 : vector<8x128xf32>
    %22 = arith.subf %21, %0 : vector<8x128xf32>
    %cst_6 = arith.constant 9.99999974E-6 : f32
    %23 = vector.broadcast %cst_6 : f32 to vector<8x128xf32>
    %24 = arith.cmpf oge, %22, %23 : vector<8x128xf32>
    %25 = arith.select %24, %18, %12 : vector<8x128xi1>, vector<8x128xf32>
    %cst_7 = arith.constant -9.99999974E-6 : f32
    %26 = vector.broadcast %cst_7 : f32 to vector<8x128xf32>
    %27 = arith.cmpf ole, %22, %26 : vector<8x128xf32>
    %28 = arith.select %27, %18, %15 : vector<8x128xi1>, vector<8x128xf32>
    %29 = arith.addf %28, %25 : vector<8x128xf32>
    %cst_8 = arith.constant 5.000000e-01 : f32
    %30 = vector.broadcast %cst_8 : f32 to vector<8x128xf32>
    %31 = arith.mulf %29, %30 : vector<8x128xf32>
    %32 = arith.mulf %31, %31 : vector<8x128xf32>
    %33 = arith.mulf %32, %31 : vector<8x128xf32>
    %34 = arith.addf %33, %31 : vector<8x128xf32>
    %35 = arith.subf %34, %0 : vector<8x128xf32>
    %cst_9 = arith.constant 9.99999974E-6 : f32
    %36 = vector.broadcast %cst_9 : f32 to vector<8x128xf32>
    %37 = arith.cmpf oge, %35, %36 : vector<8x128xf32>
    %38 = arith.select %37, %31, %25 : vector<8x128xi1>, vector<8x128xf32>
    %cst_10 = arith.constant -9.99999974E-6 : f32
    %39 = vector.broadcast %cst_10 : f32 to vector<8x128xf32>
    %40 = arith.cmpf ole, %35, %39 : vector<8x128xf32>
    %41 = arith.select %40, %31, %28 : vector<8x128xi1>, vector<8x128xf32>
    %42 = arith.addf %41, %38 : vector<8x128xf32>
    %cst_11 = arith.constant 5.000000e-01 : f32
    %43 = vector.broadcast %cst_11 : f32 to vector<8x128xf32>
    %44 = arith.mulf %42, %43 : vector<8x128xf32>
    %45 = arith.mulf %44, %44 : vector<8x128xf32>
    %46 = arith.mulf %45, %44 : vector<8x128xf32>
    %47 = arith.addf %46, %44 : vector<8x128xf32>
    %48 = arith.subf %47, %0 : vector<8x128xf32>
    %c0_i32 = arith.constant 0 : i32
    %49:5 = scf.while (%arg5 = %c0_i32, %arg6 = %41, %arg7 = %38, %arg8 = %44, %arg9 = %48) : (i32, vector<8x128xf32>, vector<8x128xf32>, vector<8x128xf32>, vector<8x128xf32>) -> (i32, vector<8x128xf32>, vector<8x128xf32>, vector<8x128xf32>, vector<8x128xf32>) {
      %c24_i32 = arith.constant 24 : i32
      %70 = arith.cmpi slt, %arg5, %c24_i32 : i32
      %71 = math.absf %arg9 : vector<8x128xf32>
      %72 = vector.shape_cast %71 : vector<8x128xf32> to vector<1x8x128xf32>
      %cst_23 = arith.constant dense<0xFF800000> : vector<1xf32>
      %73 = vector.multi_reduction <maximumf>, %72, %cst_23 [1, 2] : vector<1x8x128xf32> to vector<1xf32>
      %74 = vector.shape_cast %73 : vector<1xf32> to vector<1x1x1xf32>
      %75 = vector.extract %74[0, 0, 0] : f32 from vector<1x1x1xf32>
      %cst_24 = arith.constant 9.99999974E-6 : f32
      %76 = arith.cmpf oge, %75, %cst_24 : f32
      %77 = arith.andi %70, %76 : i1
      scf.condition(%77) %arg5, %arg6, %arg7, %arg8, %arg9 : i32, vector<8x128xf32>, vector<8x128xf32>, vector<8x128xf32>, vector<8x128xf32>
    } do {
    ^bb0(%arg5: i32, %arg6: vector<8x128xf32>, %arg7: vector<8x128xf32>, %arg8: vector<8x128xf32>, %arg9: vector<8x128xf32>):
      %cst_23 = arith.constant 9.99999974E-6 : f32
      %70 = vector.broadcast %cst_23 : f32 to vector<8x128xf32>
      %71 = arith.cmpf oge, %arg9, %70 : vector<8x128xf32>
      %72 = arith.select %71, %arg8, %arg7 : vector<8x128xi1>, vector<8x128xf32>
      %cst_24 = arith.constant -9.99999974E-6 : f32
      %73 = vector.broadcast %cst_24 : f32 to vector<8x128xf32>
      %74 = arith.cmpf ole, %arg9, %73 : vector<8x128xf32>
      %75 = arith.select %74, %arg8, %arg6 : vector<8x128xi1>, vector<8x128xf32>
      %76 = arith.addf %75, %72 : vector<8x128xf32>
      %cst_25 = arith.constant 5.000000e-01 : f32
      %77 = vector.broadcast %cst_25 : f32 to vector<8x128xf32>
      %78 = arith.mulf %76, %77 : vector<8x128xf32>
      %79 = arith.mulf %78, %78 : vector<8x128xf32>
      %80 = arith.mulf %79, %78 : vector<8x128xf32>
      %81 = arith.addf %80, %78 : vector<8x128xf32>
      %82 = arith.subf %81, %0 : vector<8x128xf32>
      %cst_26 = arith.constant 3.000000e+00 : f32
      %83 = vector.broadcast %cst_26 : f32 to vector<8x128xf32>
      %84 = arith.mulf %83, %78 : vector<8x128xf32>
      %85 = arith.mulf %84, %78 : vector<8x128xf32>
      %cst_27 = arith.constant 1.000000e+00 : f32
      %86 = vector.broadcast %cst_27 : f32 to vector<8x128xf32>
      %87 = arith.addf %85, %86 : vector<8x128xf32>
      %cst_28 = arith.constant 9.99999974E-6 : f32
      %88 = vector.broadcast %cst_28 : f32 to vector<8x128xf32>
      %89 = arith.cmpf oge, %82, %88 : vector<8x128xf32>
      %90 = arith.select %89, %78, %72 : vector<8x128xi1>, vector<8x128xf32>
      %cst_29 = arith.constant -9.99999974E-6 : f32
      %91 = vector.broadcast %cst_29 : f32 to vector<8x128xf32>
      %92 = arith.cmpf ole, %82, %91 : vector<8x128xf32>
      %93 = arith.select %92, %78, %75 : vector<8x128xi1>, vector<8x128xf32>
      %94 = arith.addf %93, %90 : vector<8x128xf32>
      %cst_30 = arith.constant 5.000000e-01 : f32
      %95 = vector.broadcast %cst_30 : f32 to vector<8x128xf32>
      %96 = arith.mulf %94, %95 : vector<8x128xf32>
      %97 = arith.mulf %96, %96 : vector<8x128xf32>
      %98 = arith.mulf %97, %96 : vector<8x128xf32>
      %99 = arith.addf %98, %96 : vector<8x128xf32>
      %100 = arith.subf %99, %0 : vector<8x128xf32>
      %cst_31 = arith.constant 3.000000e+00 : f32
      %101 = vector.broadcast %cst_31 : f32 to vector<8x128xf32>
      %102 = arith.mulf %101, %96 : vector<8x128xf32>
      %103 = arith.mulf %102, %96 : vector<8x128xf32>
      %cst_32 = arith.constant 1.000000e+00 : f32
      %104 = vector.broadcast %cst_32 : f32 to vector<8x128xf32>
      %105 = arith.addf %103, %104 : vector<8x128xf32>
      %cst_33 = arith.constant 9.99999974E-6 : f32
      %106 = vector.broadcast %cst_33 : f32 to vector<8x128xf32>
      %107 = arith.cmpf oge, %100, %106 : vector<8x128xf32>
      %108 = arith.select %107, %96, %90 : vector<8x128xi1>, vector<8x128xf32>
      %cst_34 = arith.constant -9.99999974E-6 : f32
      %109 = vector.broadcast %cst_34 : f32 to vector<8x128xf32>
      %110 = arith.cmpf ole, %100, %109 : vector<8x128xf32>
      %111 = arith.select %110, %96, %93 : vector<8x128xi1>, vector<8x128xf32>
      %112 = arith.addf %111, %108 : vector<8x128xf32>
      %cst_35 = arith.constant 5.000000e-01 : f32
      %113 = vector.broadcast %cst_35 : f32 to vector<8x128xf32>
      %114 = arith.mulf %112, %113 : vector<8x128xf32>
      %115 = arith.mulf %114, %114 : vector<8x128xf32>
      %116 = arith.mulf %115, %114 : vector<8x128xf32>
      %117 = arith.addf %116, %114 : vector<8x128xf32>
      %118 = arith.subf %117, %0 : vector<8x128xf32>
      %cst_36 = arith.constant 3.000000e+00 : f32
      %119 = vector.broadcast %cst_36 : f32 to vector<8x128xf32>
      %120 = arith.mulf %119, %114 : vector<8x128xf32>
      %121 = arith.mulf %120, %114 : vector<8x128xf32>
      %cst_37 = arith.constant 1.000000e+00 : f32
      %122 = vector.broadcast %cst_37 : f32 to vector<8x128xf32>
      %123 = arith.addf %121, %122 : vector<8x128xf32>
      %cst_38 = arith.constant 9.99999974E-6 : f32
      %124 = vector.broadcast %cst_38 : f32 to vector<8x128xf32>
      %125 = arith.cmpf oge, %118, %124 : vector<8x128xf32>
      %126 = arith.select %125, %114, %108 : vector<8x128xi1>, vector<8x128xf32>
      %cst_39 = arith.constant -9.99999974E-6 : f32
      %127 = vector.broadcast %cst_39 : f32 to vector<8x128xf32>
      %128 = arith.cmpf ole, %118, %127 : vector<8x128xf32>
      %129 = arith.select %128, %114, %111 : vector<8x128xi1>, vector<8x128xf32>
      %130 = arith.addf %129, %126 : vector<8x128xf32>
      %cst_40 = arith.constant 5.000000e-01 : f32
      %131 = vector.broadcast %cst_40 : f32 to vector<8x128xf32>
      %132 = arith.mulf %130, %131 : vector<8x128xf32>
      %133 = arith.mulf %132, %132 : vector<8x128xf32>
      %134 = arith.mulf %133, %132 : vector<8x128xf32>
      %135 = arith.addf %134, %132 : vector<8x128xf32>
      %136 = arith.subf %135, %0 : vector<8x128xf32>
      %cst_41 = arith.constant 3.000000e+00 : f32
      %137 = vector.broadcast %cst_41 : f32 to vector<8x128xf32>
      %138 = arith.mulf %137, %132 : vector<8x128xf32>
      %139 = arith.mulf %138, %132 : vector<8x128xf32>
      %cst_42 = arith.constant 1.000000e+00 : f32
      %140 = vector.broadcast %cst_42 : f32 to vector<8x128xf32>
      %141 = arith.addf %139, %140 : vector<8x128xf32>
      %c1_i32 = arith.constant 1 : i32
      %142 = arith.addi %arg5, %c1_i32 : i32
      scf.yield %142, %129, %126, %132, %136 : i32, vector<8x128xf32>, vector<8x128xf32>, vector<8x128xf32>, vector<8x128xf32>
    }
    %50 = arith.mulf %49#3, %49#3 : vector<8x128xf32>
    %51 = arith.mulf %50, %49#3 : vector<8x128xf32>
    %52 = arith.addf %51, %49#3 : vector<8x128xf32>
    %53 = arith.subf %52, %0 : vector<8x128xf32>
    %cst_12 = arith.constant 3.000000e+00 : f32
    %54 = vector.broadcast %cst_12 : f32 to vector<8x128xf32>
    %55 = arith.mulf %54, %49#3 : vector<8x128xf32>
    %56 = arith.mulf %55, %49#3 : vector<8x128xf32>
    %cst_13 = arith.constant 1.000000e+00 : f32
    %57 = vector.broadcast %cst_13 : f32 to vector<8x128xf32>
    %58 = arith.addf %56, %57 : vector<8x128xf32>
    %c0_14 = arith.constant 0 : index
    %c0_15 = arith.constant 0 : index
    %59 = vector.load %arg2[%c0_14, %c0_15] : memref<8x128xf32, #tpu.memory_space<vmem>>, vector<8x128xf32>
    tpu.vector_store %arg2[%c0_14, %c0_15], %49#3 {strides = array<i32>} : memref<8x128xf32, #tpu.memory_space<vmem>>, vector<8x128xf32>,
    %cst_16 = arith.constant 0.000000e+00 : f32
    %60 = vector.broadcast %cst_16 : f32 to vector<8x128xf32>
    %61 = arith.subf %60, %58 : vector<8x128xf32>
    %c0_17 = arith.constant 0 : index
    %c0_18 = arith.constant 0 : index
    %62 = vector.load %arg3[%c0_17, %c0_18] : memref<8x128xf32, #tpu.memory_space<vmem>>, vector<8x128xf32>
    tpu.vector_store %arg3[%c0_17, %c0_18], %61 {strides = array<i32>} : memref<8x128xf32, #tpu.memory_space<vmem>>, vector<8x128xf32>,
    %63 = math.absf %53 : vector<8x128xf32>
    %64 = vector.shape_cast %63 : vector<8x128xf32> to vector<1x8x128xf32>
    %cst_19 = arith.constant dense<0xFF800000> : vector<1xf32>
    %65 = vector.multi_reduction <maximumf>, %64, %cst_19 [1, 2] : vector<1x8x128xf32> to vector<1xf32>
    %66 = vector.shape_cast %65 : vector<1xf32> to vector<1x1x1xf32>
    %67 = vector.extract %66[0, 0, 0] : f32 from vector<1x1x1xf32>
    %68 = vector.broadcast %67 : f32 to vector<1x8x128xf32>
    %c0_20 = arith.constant 0 : index
    %c0_21 = arith.constant 0 : index
    %c0_22 = arith.constant 0 : index
    %69 = vector.load %arg4[%c0_20, %c0_21, %c0_22] : memref<1x8x128xf32, #tpu.memory_space<vmem>>, vector<1x8x128xf32>
    tpu.vector_store %arg4[%c0_20, %c0_21, %c0_22], %68 {strides = array<i32>} : memref<1x8x128xf32, #tpu.memory_space<vmem>>, vector<1x8x128xf32>,
    return
  }
  func.func @transform_0(%arg0: i32) -> (i32, i32) {
    %c0_i32 = arith.constant 0 : i32
    %c0_i32_0 = arith.constant 0 : i32
    return %arg0, %c0_i32 : i32, i32
  }
  func.func @transform_1(%arg0: i32) -> (i32, i32) {
    %c0_i32 = arith.constant 0 : i32
    %c0_i32_0 = arith.constant 0 : i32
    return %arg0, %c0_i32 : i32, i32
  }
  func.func @transform_2(%arg0: i32) -> (i32, i32) {
    %c0_i32 = arith.constant 0 : i32
    %c0_i32_0 = arith.constant 0 : i32
    return %arg0, %c0_i32 : i32, i32
  }
  func.func @transform_3(%arg0: i32) -> (i32, i32, i32) {
    %c0_i32 = arith.constant 0 : i32
    %c0_i32_0 = arith.constant 0 : i32
    %c0_i32_1 = arith.constant 0 : i32
    return %arg0, %c0_i32, %c0_i32_0 : i32, i32, i32
  }
}

</mosaic_0001>

<bundles_post_ra>
// kernel: tpu_custom_call.1
= control target key start
LH: loop header
LB: loop body
LE: loop exit
PB: predicated region body
PF: predicated region fallthrough
CT: control target
= control target key end

     0   :  { %9 = vsyncpa [#allocation3], 0  ;;  %s494_s0 = inlined_call_operand.hbm [shape: f32[8,128], index: 0, kind: input, shape index: {}]   ;;  %s495_s1 = inlined_call_operand.hbm [shape: f32[8,128], index: 1, kind: output, shape index: {0}]   ;;  %s496_s2 = inlined_call_operand.hbm [shape: f32[8,128], index: 2, kind: output, shape index: {1}]   ;;  %s497_s3 = inlined_call_operand.hbm [shape: f32[1,8,128], index: 3, kind: output, shape index: {2}]  }
   0x1   :  { %10 = vsyncpa [#allocation4], 0 }
   0x2   :  { %11 = vsyncpa [#allocation7], 0  ;;  %s408_s12 = smov [#allocation2]  }
   0x3   :  { %s18_s13 = sshll.u32 %s408_s12, 4  ;;  %s19_s13 = int_to_ptr.vmem [resolvable:$true] %s18_s13 }
   0x4   :  { %s282_s14 = scalar_lea.vmem %s19_s13, 128  ;;  %p287_p1 = scmp.lt.s32.totalorder %s19_s13, %s19_s13 }
   0x5   :  { %p283_p0 = scmp.ne.s32.totalorder %s19_s13, %s282_s14  ;;  %p288_p2 = scmp.lt.s32.totalorder %s282_s14, %s282_s14 }
   0x7   :  { %p289_p3 = por %p288_p2, %p287_p1 }
   0x9   :  { %p290_p4 = pnand %p289_p3, %p283_p0 }
   0xb   :  { %293 = shalt.err (!%p290_p4)
}
   0xc   :  { %21 = dma.hbm_to_vmem [thread:$0]  %s494_s0, 128, %s19_s13, [#allocation3]  }
   0xd   :  { %378 = dma.done.wait [#allocation3], 128  }
   0xe   :  { %379 = vsyncadd [#allocation3], 4294967168  ;;  %v437_v0 = vld [vmem:[#allocation2] sm:$0xff]  ;;  %v409_v2 = vmov 1.0   ;;  %v410_v4 = vmov 0.0  }
   0xf   :  { %v26_v1 = vsub.f32 0.625, %v437_v0 }
  0x11   :  { %vm27_vm0 = vcmp.ge.f32.partialorder %v26_v1, 1e-05  ;;  %vm29_vm1 = vcmp.le.f32.partialorder %v26_v1, -1e-05 }
  0x12   :  { %v28_v3 = vsel %vm27_vm0, 0.5, %v409_v2  ;;  %v30_v5 = vsel %vm29_vm1, 0.5, %v410_v4 }
  0x13   :  { %v31_v6 = vadd.f32 %v30_v5, %v28_v3 }
  0x15   :  { %v32_v7 = vmul.f32 0.5, %v31_v6 }
  0x17   :  { %v33_v8 = vmul.f32 %v32_v7, %v32_v7 }
  0x19   :  { %v34_v9 = vmul.f32 %v33_v8, %v32_v7 }
  0x1b   :  { %v35_v10 = vadd.f32 %v34_v9, %v32_v7 }
  0x1d   :  { %v36_v11 = vsub.f32 %v35_v10, %v437_v0 }
  0x1f   :  { %vm37_vm2 = vcmp.ge.f32.partialorder %v36_v11, 1e-05  ;;  %vm39_vm3 = vcmp.le.f32.partialorder %v36_v11, -1e-05 }
  0x20   :  { %v38_v12 = vsel %vm37_vm2, %v32_v7, %v28_v3  ;;  %v40_v13 = vsel %vm39_vm3, %v32_v7, %v30_v5 }
  0x21   :  { %v41_v14 = vadd.f32 %v40_v13, %v38_v12 }
  0x23   :  { %v42_v15 = vmul.f32 0.5, %v41_v14 }
  0x25   :  { %v43_v16 = vmul.f32 %v42_v15, %v42_v15 }
  0x27   :  { %v44_v17 = vmul.f32 %v43_v16, %v42_v15 }
  0x29   :  { %v45_v18 = vadd.f32 %v44_v17, %v42_v15 }
  0x2b   :  { %v46_v19 = vsub.f32 %v45_v18, %v437_v0 }
  0x2d   :  { %vm47_vm4 = vcmp.ge.f32.partialorder %v46_v19, 1e-05  ;;  %vm49_vm5 = vcmp.le.f32.partialorder %v46_v19, -1e-05 }
  0x2e   :  { %v48_v20 = vsel %vm47_vm4, %v42_v15, %v38_v12   ;;  %v50_v21 = vsel %vm49_vm5, %v42_v15, %v40_v13  }
  0x2f   :  { %v51_v22 = vadd.f32 %v50_v21, %v48_v20 }
  0x31   :  { %v52_v23 = vmul.f32 0.5, %v51_v22  }
  0x33   :  { %v53_v24 = vmul.f32 %v52_v23, %v52_v23  ;;  %v498_v36 = vmov %v52_v23 }
  0x35   :  { %v54_v25 = vmul.f32 %v53_v24, %v52_v23 }
  0x37   :  { %v55_v26 = vadd.f32 %v54_v25, %v52_v23 }
  0x39   :  { %v56_v27 = vsub.f32 %v55_v26, %v437_v0  }
  0x3b   :  { %v190_v28 = vand.u32 2147483647, %v56_v27 }
  0x3d   :  { %191 = vmax.xlane.f32.xlu0 %v190_v28 }
  0xc6   :  { %v192_v29 = vpop.xlane.xlu0 %191 }
  0xc7   :  { %v193_v30 = vrot.slane %v192_v29, 4 }
  0xc9   :  { %v194_v31 = vmax.f32 %v192_v29, %v193_v30 }
  0xcb   :  { %v195_v32 = vrot.slane %v194_v31, 2 }
  0xcd   :  { %v196_v33 = vmax.f32 %v194_v31, %v195_v32 }
  0xcf   :  { %v197_v34 = vrot.slane %v196_v33, 1 }
  0xd1   :  { %v198_v35 = vmax.f32 %v196_v33, %v197_v34 }
  0xd3   :  { %214 = vpush %v198_v35 }
 0x104   :  { %s215_s0 = spop %214 }
 0x105   :  { %p200_p5 = scmp.ge.f32.partialorder %s215_s0, 1e-05 }
 0x106   :  { %s453_s17 = smov (%p200_p5), 0  }
 0x107   :  { %202 = sbr.rel (!%p200_p5) target bundleno = 535 (0x217), region = 45 }
 0x10c LB: > { %vm79_vm6 = vcmp.ge.f32.partialorder %v386_v27, 1e-05  ;;  %vm81_vm7 = vcmp.le.f32.partialorder %v386_v27, -1e-05  ;;  %s119_s18 = sadd.s32 1, %s402_s17   ;;  %s402_s17 = sphi %s453_s17, %s500_s17   ;;  %v398_v21 = vphi %v50_v21, %v112_v21   ;;  %v394_v20 = vphi %v48_v20, %v110_v20   ;;  %v390_v23 = vphi %v52_v23, %v499_v23   ;;  %v386_v27 = vphi %v56_v27, %v118_v27  }
 0x10d   : > { %v80_v37 = vsel %vm79_vm6, %v390_v23, %v394_v20  ;;  %v82_v38 = vsel %vm81_vm7, %v390_v23, %v398_v21  ;;  %p63_p6 = scmp.lt.s32.totalorder %s119_s18, 24  ;;  %s500_s17 = smov %s119_s18 }
 0x10e   : > { %v83_v39 = vadd.f32 %v82_v38, %v80_v37 }
 0x110   : > { %v84_v40 = vmul.f32 0.5, %v83_v39 }
 0x112   : > { %v85_v41 = vmul.f32 %v84_v40, %v84_v40 }
 0x114   : > { %v86_v42 = vmul.f32 %v85_v41, %v84_v40 }
 0x116   : > { %v87_v43 = vadd.f32 %v86_v42, %v84_v40 }
 0x118   : > { %v88_v44 = vsub.f32 %v87_v43, %v437_v0 }
 0x11a   : > { %vm89_vm8 = vcmp.ge.f32.partialorder %v88_v44, 1e-05  ;;  %vm91_vm9 = vcmp.le.f32.partialorder %v88_v44, -1e-05 }
 0x11b   : > { %v90_v45 = vsel %vm89_vm8, %v84_v40, %v80_v37  ;;  %v92_v46 = vsel %vm91_vm9, %v84_v40, %v82_v38 }
 0x11c   : > { %v93_v47 = vadd.f32 %v92_v46, %v90_v45 }
 0x11e   : > { %v94_v48 = vmul.f32 0.5, %v93_v47 }
 0x120   : > { %v95_v49 = vmul.f32 %v94_v48, %v94_v48 }
 0x122   : > { %v96_v50 = vmul.f32 %v95_v49, %v94_v48 }
 0x124   : > { %v97_v51 = vadd.f32 %v96_v50, %v94_v48 }
 0x126   : > { %v98_v52 = vsub.f32 %v97_v51, %v437_v0 }
 0x128   : > { %vm99_vm10 = vcmp.ge.f32.partialorder %v98_v52, 1e-05  ;;  %vm101_vm11 = vcmp.le.f32.partialorder %v98_v52, -1e-05 }
 0x129   : > { %v100_v53 = vsel %vm99_vm10, %v94_v48, %v90_v45  ;;  %v102_v54 = vsel %vm101_vm11, %v94_v48, %v92_v46 }
 0x12a   : > { %v103_v55 = vadd.f32 %v102_v54, %v100_v53 }
 0x12c   : > { %v104_v56 = vmul.f32 0.5, %v103_v55 }
 0x12e   : > { %v105_v57 = vmul.f32 %v104_v56, %v104_v56 }
 0x130   : > { %v106_v58 = vmul.f32 %v105_v57, %v104_v56 }
 0x132   : > { %v107_v59 = vadd.f32 %v106_v58, %v104_v56 }
 0x134   : > { %v108_v60 = vsub.f32 %v107_v59, %v437_v0 }
 0x136   : > { %vm109_vm12 = vcmp.ge.f32.partialorder %v108_v60, 1e-05  ;;  %vm111_vm13 = vcmp.le.f32.partialorder %v108_v60, -1e-05 }
 0x137   : > { %v110_v20 = vsel %vm109_vm12, %v104_v56, %v100_v53   ;;  %v112_v21 = vsel %vm111_vm13, %v104_v56, %v102_v54  }
 0x138   : > { %v113_v61 = vadd.f32 %v112_v21, %v110_v20 }
 0x13a   : > { %v114_v62 = vmul.f32 0.5, %v113_v61  }
 0x13c   : > { %v115_v63 = vmul.f32 %v114_v62, %v114_v62  ;;  %v499_v23 = vmov %v114_v62 }
 0x13e   : > { %v116_v1 = vmul.f32 %v115_v63, %v114_v62 }
 0x140   : > { %v117_v2 = vadd.f32 %v116_v1, %v114_v62 }
 0x142   : > { %v118_v27 = vsub.f32 %v117_v2, %v437_v0  }
 0x144   : > { %v64_v3 = vand.u32 2147483647, %v118_v27 }
 0x146   : > { %65 = vmax.xlane.f32.xlu0 %v64_v3 }
 0x1cf   : > { %v66_v4 = vpop.xlane.xlu0 %65 }
 0x1d0   : > { %v67_v5 = vrot.slane %v66_v4, 4 }
 0x1d2   : > { %v68_v6 = vmax.f32 %v66_v4, %v67_v5 }
 0x1d4   : > { %v69_v7 = vrot.slane %v68_v6, 2 }
 0x1d6   : > { %v70_v8 = vmax.f32 %v68_v6, %v69_v7 }
 0x1d8   : > { %v71_v9 = vrot.slane %v70_v8, 1 }
 0x1da   : > { %v72_v10 = vmax.f32 %v70_v8, %v71_v9 }
 0x1dc   : > { %216 = vpush %v72_v10 }
 0x20d   : > { %s217_s19 = spop %216 }
 0x20e   : > { %p74_p7 = scmp.ge.f32.partialorder %s217_s19, 1e-05 }
 0x210   : > { %p75_p8 = pnand %p74_p7, %p63_p6 }
 0x211   :  { %v501_v36 = vmov (%p75_p8), %v114_v62 }
 0x212   :  { %78 = sbr.rel (!%p75_p8) target bundleno = 268 (0x10c), region = 51 }
 0x217 PF:  { %v120_v11 = vmul.f32 %v406_v36, %v406_v36  ;;  %127 = vst [vmem:[#allocation5] sm:$0xff] %v406_v36  ;;  %v124_v16 = vmul.f32 3.0, %v406_v36  ;;  %s411_s20 = smov [#allocation6]   ;;  %s412_s22 = smov [#allocation5]   ;;  %v406_v36 = vphi %v498_v36, %v501_v36  }
 0x218   :  { %s158_s21 = sshll.u32 %s411_s20, 4  ;;  %s148_s23 = sshll.u32 %s412_s22, 4  ;;  %s159_s21 = int_to_ptr.vmem [resolvable:$true] %s158_s21  ;;  %s149_s23 = int_to_ptr.vmem [resolvable:$true] %s148_s23 }
 0x219   :  { %v121_v12 = vmul.f32 %v406_v36, %v120_v11  ;;  %v125_v17 = vmul.f32 %v406_v36, %v124_v16  ;;  %s294_s24 = scalar_lea.vmem %s159_s21, 128  ;;  %p299_p10 = scmp.lt.s32.totalorder %s159_s21, %s159_s21 }
 0x21a   :  { %p295_p9 = scmp.ne.s32.totalorder %s159_s21, %s294_s24  ;;  %p300_p11 = scmp.lt.s32.totalorder %s294_s24, %s294_s24 }
 0x21b   :  { %v122_v13 = vadd.f32 %v406_v36, %v121_v12  ;;  %v126_v18 = vadd.f32 1.0, %v125_v17 }
 0x21c   :  { %p301_p12 = por %p300_p11, %p299_p10 }
 0x21d   :  { %v123_v14 = vsub.f32 %v122_v13, %v437_v0  ;;  %v128_v19 = vsub.f32 0.0, %v126_v18 }
 0x21e   :  { %p302_p13 = pnand %p301_p12, %p295_p9 }
 0x21f   :  { %v130_v15 = vand.u32 2147483647, %v123_v14  ;;  %129 = vst [vmem:[#allocation6] sm:$0xff] %v128_v19 }
 0x221   :  { %131 = vmax.xlane.f32.xlu0 %v130_v15 }
 0x222   :  { %305 = shalt.err (!%p302_p13)
}
 0x223   :  { %161 = dma.vmem_to_hbm [thread:$0]  %s159_s21, 128, %s496_s2, [#allocation7]  }
 0x224   :  { %s314_s27 = scalar_lea.vmem %s149_s23, 128  ;;  %p319_p1 = scmp.lt.s32.totalorder %s149_s23, %s149_s23 }
 0x225   :  { %p315_p0 = scmp.ne.s32.totalorder %s149_s23, %s314_s27  ;;  %p320_p2 = scmp.lt.s32.totalorder %s314_s27, %s314_s27 }
 0x227   :  { %p321_p3 = por %p320_p2, %p319_p1 }
 0x229   :  { %p322_p4 = pnand %p321_p3, %p315_p0 }
 0x22b   :  { %325 = shalt.err (!%p322_p4)
}
 0x22c   :  { %151 = dma.vmem_to_hbm [thread:$0]  %s149_s23, 128, %s495_s1, [#allocation4]  }
 0x22d   :  { %s413_s2 = smov [#allocation8]  }
 0x22e   :  { %s168_s30 = sshll.u32 %s413_s2, 4  ;;  %s169_s30 = int_to_ptr.vmem [resolvable:$true] %s168_s30 }
 0x22f   :  { %s334_s5 = scalar_lea.vmem %s169_s30, 128  ;;  %p339_p6 = scmp.lt.s32.totalorder %s169_s30, %s169_s30 }
 0x230   :  { %p335_p5 = scmp.ne.s32.totalorder %s169_s30, %s334_s5  ;;  %p340_p7 = scmp.lt.s32.totalorder %s334_s5, %s334_s5 }
 0x232   :  { %p341_p8 = por %p340_p7, %p339_p6 }
 0x234   :  { %p342_p9 = pnand %p341_p8, %p335_p5 }
 0x2aa   :  { %v132_v0 = vpop.xlane.xlu0 %131 }
 0x2ab   :  { %v133_v20 = vrot.slane %v132_v0, 4 }
 0x2ad   :  { %v134_v21 = vmax.f32 %v132_v0, %v133_v20 }
 0x2af   :  { %v135_v22 = vrot.slane %v134_v21, 2 }
 0x2b1   :  { %v136_v23 = vmax.f32 %v134_v21, %v135_v22 }
 0x2b3   :  { %v137_v24 = vrot.slane %v136_v23, 1 }
 0x2b5   :  { %v138_v25 = vmax.f32 %v136_v23, %v137_v24 }
 0x2b7   :  { %218 = vpush %v138_v25 }
 0x2e8   :  { %s219_s4 = spop %218 }
 0x2e9   :  { %v140_v26 = vstv %s219_s4 }
 0x2ea   :  { %141 = vst [vmem:[#allocation8] sm:$0xff] %v140_v26 }
 0x2eb   :  { %345 = shalt.err (!%p342_p9)
}
 0x2ec   :  { %171 = dma.vmem_to_hbm [thread:$0]  %s169_s30, 128, %s497_s3, [#allocation7]  }
 0x2ed   :  { %380 = dma.done.wait [#allocation4], 128  }
 0x2ee   :  { %381 = vsyncadd [#allocation4], 4294967168 }
 0x2ef   :  { %382 = dma.done.wait [#allocation7], 256  }
 0x2f0   :  { %383 = vsyncadd [#allocation7], 4294967040 }
 0x2f1   :  { %181 = vsyncpa [#allocation3], 1 }
 0x2f2   :  { %182 = vsyncpa [#allocation4], 1 }
 0x2f3   :  { %183 = vsyncpa [#allocation7], 1 }

</bundles_post_ra>
